<compile_context>
chip_gen: v7x
topology: tpu7x:2x2x1
jax: 0.10.0
libtpu: 0.0.40
codegen_flags: <defaults>
</compile_context>

<pallas_src>
import numpy as np
import jax
import jax.numpy as jnp
from jax.experimental import pallas as pl
from jax.experimental.pallas import tpu as pltpu


def _build_kernel(W, HW, stride, downsampling):
    """One grid step = one image: activations are (C, HW) with HW in the lane axis."""

    def kernel(*refs):
        it = iter(refs)
        x_ref = next(it)                      # (Cinp, HW) bf16  (or (C3, HW) f32 if identity)
        m_ref = next(it)                      # (8, HW) f32 border-validity masks
        w1_ref, b1_ref = next(it), next(it)   # (C1p, Cin*) bf16 , (C1p, 1) f32
        w2_ref, b2_ref = next(it), next(it)   # (C1p, 9*C1p) bf16, (C1p, 1) f32
        w34_ref, b34_ref = next(it), next(it) # (C3, K) bf16     , (C3, 1) f32
        if stride > 1:
            sel_ref = next(it)                # (HW, HWout) bf16 0/1 selection
        o_ref = next(it)                      # (C3, HWout) f32

        if downsampling:
            xb = x_ref[...]                   # already bf16 (pre-cast in wrapper)
        else:
            x = x_ref[...]                    # f32 (needed for the identity residual)
            xb = x.astype(jnp.bfloat16)

        # ---- conv1x1 (BN scale folded into w1 rows) + bias + ReLU --------------------
        t1 = jnp.dot(w1_ref[...], xb, preferred_element_type=jnp.float32)    # (C1p, HW)
        t1 = jnp.maximum(t1 + b1_ref[...], 0.0)                              # f32

        # ---- conv3x3 (pad=1) as ONE matmul over a bf16 im2col built from 9 taps ------
        # tap (dh,dw): rolled[:, p] = t1[:, p + dh*W + dw]; static mask kills the rows
        # that fall outside the image (including the lane wrap introduced by the roll).
        taps = []
        mi = 0
        for kh in range(3):
            for kw in range(3):
                dh, dw = kh - 1, kw - 1
                if dh == 0 and dw == 0:
                    taps.append(t1.astype(jnp.bfloat16))
                    continue
                off = dh * W + dw
                rolled = pltpu.roll(t1, shift=(-off) % HW, axis=1)           # XLU rotation
                masked = rolled * m_ref[mi:mi + 1, :]                        # f32 mask
                taps.append(masked.astype(jnp.bfloat16))                     # cast per tap
                mi += 1
        im2col = jnp.concatenate(taps, axis=0)            # (9*C1p, HW) bf16, 16-row tiles
        t2 = jnp.dot(w2_ref[...], im2col, preferred_element_type=jnp.float32)
        t2 = jnp.maximum(t2 + b2_ref[...], 0.0)           # (C1p, HW) f32

        # ---- fused final 1x1 conv (+ downsample 1x1 conv) + combined bias + ReLU -----
        if downsampling:
            fused_in = jnp.concatenate([t2.astype(jnp.bfloat16), xb], axis=0)  # (C1p+Cinp, HW)
            if stride > 1:
                # strided output positions via 0/1 selection (exact: one 1 per column)
                fused_in = jnp.dot(fused_in, sel_ref[...],
                                   preferred_element_type=jnp.float32).astype(jnp.bfloat16)
            t3 = jnp.dot(w34_ref[...], fused_in, preferred_element_type=jnp.float32)
            o_ref[...] = jnp.maximum(t3 + b34_ref[...], 0.0).astype(o_ref.dtype)
        else:
            t3 = jnp.dot(w34_ref[...], t2.astype(jnp.bfloat16),
                         preferred_element_type=jnp.float32)
            o_ref[...] = jnp.maximum(t3 + b34_ref[...] + x, 0.0).astype(o_ref.dtype)

    return kernel


def se_resnet_block(x_nchw, params, *, stride=1, downsampling=False, expansion=4,
                    eps=1e-5):
    """Fused forward pass. x_nchw: (N, Cin, H, W) -> (N, C3, Hout, Wout) (PyTorch layout)."""
    N, Cin, H, W = x_nchw.shape
    C1 = params["w1"].shape[0]
    C3 = params["w3"].shape[0]
    assert C3 == C1 * expansion
    if not downsampling:
        assert Cin == C3 and stride == 1, "identity shortcut needs Cin == C3 and stride == 1"
    if stride > 1:
        assert downsampling, "stride > 1 requires the downsampling shortcut"

    Hout = (H - 1) // stride + 1
    Wout = (W - 1) // stride + 1
    HW, HWout = H * W, Hout * Wout
    assert HW % 128 == 0 and HWout % 128 == 0, \
        "per-image spatial size must be a multiple of 128 lanes (toy/demo constraint)"

    # pad the bottleneck / input channel counts to the bf16 sublane tile (16) so every
    # in-kernel sublane concat (im2col taps, [t2; x]) is tile-aligned.
    SUB = 16
    C1p = -(-C1 // SUB) * SUB
    Cinp = (-(-Cin // SUB) * SUB) if downsampling else Cin

    def fold(stats):                     # eval-mode BN -> per-channel (scale, bias)
        g, b, m, v = stats
        s = g / jnp.sqrt(v + eps)
        return s, b - m * s

    s1, b1v = fold(params["bn1"])
    s2, b2v = fold(params["bn2"])
    s3, b3v = fold(params["bn3"])

    # conv1: row-scale by BN, pad to (C1p, Cinp/Cin), bf16
    w1 = params["w1"].reshape(C1, Cin) * s1[:, None]
    w1 = jnp.pad(w1, ((0, C1p - C1), (0, Cinp - Cin))).astype(jnp.bfloat16)
    b1 = jnp.pad(b1v.reshape(C1, 1), ((0, C1p - C1), (0, 0))).astype(jnp.float32)

    # conv2: OIHW row-scaled -> (co, kh, kw, ci), pad co & ci to C1p -> (C1p, 9*C1p) bf16.
    # Column index (kh*3+kw)*C1p + ci matches the in-kernel tap concatenation order.
    w2 = params["w2"] * s2[:, None, None, None]
    w2 = jnp.transpose(w2, (0, 2, 3, 1))
    w2 = jnp.pad(w2, ((0, C1p - C1), (0, 0), (0, 0), (0, C1p - C1)))
    w2 = w2.reshape(C1p, 9 * C1p).astype(jnp.bfloat16)
    b2 = jnp.pad(b2v.reshape(C1, 1), ((0, C1p - C1), (0, 0))).astype(jnp.float32)

    # conv3 (+ fused downsample conv): row-scale by BN, pad contraction columns.
    w3 = params["w3"].reshape(C3, C1) * s3[:, None]
    w3 = jnp.pad(w3, ((0, 0), (0, C1p - C1)))
    if downsampling:
        sd, bdv = fold(params["bnd"])
        wd = params["wd"].reshape(C3, Cin) * sd[:, None]
        wd = jnp.pad(wd, ((0, 0), (0, Cinp - Cin)))
        w34 = jnp.concatenate([w3, wd], axis=1).astype(jnp.bfloat16)     # (C3, C1p+Cinp)
        b34 = (b3v + bdv).reshape(C3, 1).astype(jnp.float32)
    else:
        w34 = w3.astype(jnp.bfloat16)
        b34 = b3v.reshape(C3, 1).astype(jnp.float32)

    # channel-major, lane-dense activation slab: (Crows, N*H*W); per-image lane blocks.
    x_cm = jnp.transpose(x_nchw, (1, 0, 2, 3)).reshape(Cin, N * HW)
    if downsampling:
        x_cm = jnp.pad(x_cm, ((0, Cinp - Cin), (0, 0))).astype(jnp.bfloat16)
    else:
        x_cm = x_cm.astype(jnp.float32)

    # static 3x3 border-validity masks (identical for every image): one row per
    # off-center tap, in (kh, kw) row-major order skipping the center.
    hh = np.arange(HW) // W
    ww = np.arange(HW) % W
    mrows = []
    for kh in range(3):
        for kw in range(3):
            dh, dw = kh - 1, kw - 1
            if dh == 0 and dw == 0:
                continue
            mrows.append(((hh + dh >= 0) & (hh + dh < H) &
                          (ww + dw >= 0) & (ww + dw < W)).astype(np.float32))
    masks = jnp.asarray(np.stack(mrows, axis=0))          # (8, HW) f32

    args = [x_cm, masks, w1, b1, w2, b2, w34, b34]
    if stride > 1:
        # per-image 0/1 selection matrix: stride-1 positions -> strided output positions
        sel = np.zeros((HW, HWout), np.float32)
        rows = (np.arange(Hout)[:, None] * stride * W
                + np.arange(Wout)[None, :] * stride).reshape(-1)
        sel[rows, np.arange(HWout)] = 1.0
        args.append(jnp.asarray(sel, jnp.bfloat16))

    def rep_spec(a):  # parameters replicated across the batch grid
        return pl.BlockSpec(a.shape, lambda n: (0, 0))

    in_specs = ([pl.BlockSpec((x_cm.shape[0], HW), lambda n: (0, n))]
                + [rep_spec(a) for a in args[1:]])
    out_specs = pl.BlockSpec((C3, HWout), lambda n: (0, n))

    kernel = _build_kernel(W, HW, stride, downsampling)
    y_cm = pl.pallas_call(
        kernel,
        out_shape=jax.ShapeDtypeStruct((C3, N * HWout), jnp.float32),
        grid_spec=pltpu.PrefetchScalarGridSpec(
            num_scalar_prefetch=0,
            grid=(N,),                            # one image per grid step (v7x: 2 TCs)
            in_specs=in_specs,
            out_specs=out_specs,
        ),
        compiler_params=pltpu.CompilerParams(dimension_semantics=("parallel",)),
    )(*args)

    return jnp.transpose(y_cm.reshape(C3, N, Hout, Wout), (1, 0, 2, 3))


def init_params(key, in_ch, out_ch, expansion=4, downsampling=False):
    """Random parameters in PyTorch conventions (conv weights OIHW, raw BN statistics)."""
    C1, C3 = out_ch, out_ch * expansion
    ks = jax.random.split(key, 8)

    def bn(k, c):
        k1, k2, k3, k4 = jax.random.split(k, 4)
        gamma = jax.random.uniform(k1, (c,), jnp.float32, 0.8, 1.2)
        beta = 0.1 * jax.random.normal(k2, (c,), jnp.float32)
        mean = 0.1 * jax.random.normal(k3, (c,), jnp.float32)
        var = jax.random.uniform(k4, (c,), jnp.float32, 0.5, 1.5)
        return (gamma, beta, mean, var)

    p = dict(
        w1=jax.random.normal(ks[0], (C1, in_ch, 1, 1), jnp.float32) / np.sqrt(in_ch),
        w2=jax.random.normal(ks[1], (C1, C1, 3, 3), jnp.float32) / np.sqrt(9 * C1),
        w3=jax.random.normal(ks[2], (C3, C1, 1, 1), jnp.float32) / np.sqrt(C1),
        bn1=bn(ks[3], C1), bn2=bn(ks[4], C1), bn3=bn(ks[5], C3),
    )
    if downsampling:
        p["wd"] = jax.random.normal(ks[6], (C3, in_ch, 1, 1), jnp.float32) / np.sqrt(in_ch)
        p["bnd"] = bn(ks[7], C3)
    return p


def ref_forward(x, p, stride, downsampling, eps=1e-5):
    """Pure-JAX NCHW reference matching the PyTorch forward (eval-mode BatchNorm)."""
    def conv(x, w, s, pad):
        return jax.lax.conv_general_dilated(
            x, w, (s, s), [(pad, pad), (pad, pad)],
            dimension_numbers=("NCHW", "OIHW", "NCHW"))

    def bn(x, stats):
        g, b, m, v = (a.reshape(1, -1, 1, 1) for a in stats)
        return (x - m) / jnp.sqrt(v + eps) * g + b

    out = jax.nn.relu(bn(conv(x, p["w1"], 1, 0), p["bn1"]))
    out = jax.nn.relu(bn(conv(out, p["w2"], stride, 1), p["bn2"]))
    out = bn(conv(out, p["w3"], 1, 0), p["bn3"])
    res = bn(conv(x, p["wd"], stride, 0), p["bnd"]) if downsampling else x
    return jax.nn.relu(out + res)


if __name__ == "__main__":
    # Module config: SE_ResNetBlock(in_ch=4, out_ch=4, stride=1, downsampling=True, expansion=4)
    N, in_ch, Hs, Ws = 2, 4, 16, 16
    out_ch, expansion, stride, downsampling = 4, 4, 1, True

    key = jax.random.PRNGKey(0)
    kx, kp = jax.random.split(key)
    x = jax.random.normal(kx, (N, in_ch, Hs, Ws), jnp.float32)   # NCHW (PyTorch convention)
    params = init_params(kp, in_ch, out_ch, expansion, downsampling)

    y = se_resnet_block(x, params, stride=stride, downsampling=downsampling,
                        expansion=expansion)
    y = jax.block_until_ready(y)

    y_ref = ref_forward(x, params, stride, downsampling)
    # tolerance absorbs the bf16 matmul operands / BN-folded bf16 weights
    # (accumulation and epilogues are f32)
    np.testing.assert_allclose(np.asarray(y), np.asarray(y_ref), rtol=2e-2, atol=2e-2)

    print("KERNEL_OK")
</pallas_src>

<mosaic_0001>
module attributes {stable_mosaic.version = 11 : i64} {
  func.func @kernel(%arg0: i32, %arg1: memref<16x256xbf16, #tpu.memory_space<vmem>>, %arg2: memref<8x256xf32, #tpu.memory_space<vmem>>, %arg3: memref<16x16xbf16, #tpu.memory_space<vmem>>, %arg4: memref<16x1xf32, #tpu.memory_space<vmem>>, %arg5: memref<16x144xbf16, #tpu.memory_space<vmem>>, %arg6: memref<16x1xf32, #tpu.memory_space<vmem>>, %arg7: memref<16x32xbf16, #tpu.memory_space<vmem>>, %arg8: memref<16x1xf32, #tpu.memory_space<vmem>>, %arg9: memref<16x256xf32, #tpu.memory_space<vmem>>) attributes {dimension_semantics = [#tpu.dimension_semantics<parallel>], iteration_bounds = array<i64: 2>, scalar_prefetch = 0 : i64, scratch_operands = 0 : i64, tpu.core_type = #tpu.core_type<tc>, window_params = [{transform_indices = @transform_0, window_bounds = array<i64: 16, 256>}, {pipeline_mode = #tpu.pipeline_mode<synchronous>, transform_indices = @transform_1, window_bounds = array<i64: 8, 256>}, {pipeline_mode = #tpu.pipeline_mode<synchronous>, transform_indices = @transform_2, window_bounds = array<i64: 16, 16>}, {pipeline_mode = #tpu.pipeline_mode<synchronous>, transform_indices = @transform_3, window_bounds = array<i64: 16, 1>}, {pipeline_mode = #tpu.pipeline_mode<synchronous>, transform_indices = @transform_4, window_bounds = array<i64: 16, 144>}, {pipeline_mode = #tpu.pipeline_mode<synchronous>, transform_indices = @transform_5, window_bounds = array<i64: 16, 1>}, {pipeline_mode = #tpu.pipeline_mode<synchronous>, transform_indices = @transform_6, window_bounds = array<i64: 16, 32>}, {pipeline_mode = #tpu.pipeline_mode<synchronous>, transform_indices = @transform_7, window_bounds = array<i64: 16, 1>}, {transform_indices = @transform_8, window_bounds = array<i64: 16, 256>}]} {
    %c0 = arith.constant 0 : index
    %c0_0 = arith.constant 0 : index
    %0 = vector.load %arg1[%c0, %c0_0] : memref<16x256xbf16, #tpu.memory_space<vmem>>, vector<16x256xbf16>
    %c0_1 = arith.constant 0 : index
    %c0_2 = arith.constant 0 : index
    %1 = vector.load %arg3[%c0_1, %c0_2] : memref<16x16xbf16, #tpu.memory_space<vmem>>, vector<16x16xbf16>
    %cst = arith.constant dense<0.000000e+00> : vector<16x256xf32>
    %2 = tpu.matmul %1, %0, %cst {dimension_numbers = #tpu.dot_dimension_numbers<[1], [0], [0], [1], [0, 0, 1, 1], [], []>} : vector<16x16xbf16>, vector<16x256xbf16>, vector<16x256xf32> -> vector<16x256xf32>
    %c0_3 = arith.constant 0 : index
    %c0_4 = arith.constant 0 : index
    %3 = vector.load %arg4[%c0_3, %c0_4] : memref<16x1xf32, #tpu.memory_space<vmem>>, vector<16x1xf32>
    %4 = vector.broadcast %3 : vector<16x1xf32> to vector<16x256xf32>
    %5 = arith.addf %2, %4 : vector<16x256xf32>
    %cst_5 = arith.constant 0.000000e+00 : f32
    %6 = vector.broadcast %cst_5 : f32 to vector<16x256xf32>
    %7 = arith.maximumf %5, %6 : vector<16x256xf32>
    %c17_i32 = arith.constant 17 : i32
    %8 = tpu.dynamic_rotate %7 by %c17_i32 dim 1 : vector<16x256xf32>, i32 -> vector<16x256xf32>
    %c0_6 = arith.constant 0 : index
    %c0_7 = arith.constant 0 : index
    %9 = vector.load %arg2[%c0_6, %c0_7] : memref<8x256xf32, #tpu.memory_space<vmem>>, vector<1x256xf32>
    %10 = vector.broadcast %9 : vector<1x256xf32> to vector<16x256xf32>
    %11 = arith.mulf %8, %10 : vector<16x256xf32>
    %12 = arith.truncf %11 : vector<16x256xf32> to vector<16x256xbf16>
    %c16_i32 = arith.constant 16 : i32
    %13 = tpu.dynamic_rotate %7 by %c16_i32 dim 1 : vector<16x256xf32>, i32 -> vector<16x256xf32>
    %c1 = arith.constant 1 : index
    %c0_8 = arith.constant 0 : index
    %14 = vector.load %arg2[%c1, %c0_8] : memref<8x256xf32, #tpu.memory_space<vmem>>, vector<1x256xf32>
    %15 = vector.broadcast %14 : vector<1x256xf32> to vector<16x256xf32>
    %16 = arith.mulf %13, %15 : vector<16x256xf32>
    %17 = arith.truncf %16 : vector<16x256xf32> to vector<16x256xbf16>
    %c15_i32 = arith.constant 15 : i32
    %18 = tpu.dynamic_rotate %7 by %c15_i32 dim 1 : vector<16x256xf32>, i32 -> vector<16x256xf32>
    %c2 = arith.constant 2 : index
    %c0_9 = arith.constant 0 : index
    %19 = vector.load %arg2[%c2, %c0_9] : memref<8x256xf32, #tpu.memory_space<vmem>>, vector<1x256xf32>
    %20 = vector.broadcast %19 : vector<1x256xf32> to vector<16x256xf32>
    %21 = arith.mulf %18, %20 : vector<16x256xf32>
    %22 = arith.truncf %21 : vector<16x256xf32> to vector<16x256xbf16>
    %c1_i32 = arith.constant 1 : i32
    %23 = tpu.dynamic_rotate %7 by %c1_i32 dim 1 : vector<16x256xf32>, i32 -> vector<16x256xf32>
    %c3 = arith.constant 3 : index
    %c0_10 = arith.constant 0 : index
    %24 = vector.load %arg2[%c3, %c0_10] : memref<8x256xf32, #tpu.memory_space<vmem>>, vector<1x256xf32>
    %25 = vector.broadcast %24 : vector<1x256xf32> to vector<16x256xf32>
    %26 = arith.mulf %23, %25 : vector<16x256xf32>
    %27 = arith.truncf %26 : vector<16x256xf32> to vector<16x256xbf16>
    %28 = arith.truncf %7 : vector<16x256xf32> to vector<16x256xbf16>
    %c255_i32 = arith.constant 255 : i32
    %29 = tpu.dynamic_rotate %7 by %c255_i32 dim 1 : vector<16x256xf32>, i32 -> vector<16x256xf32>
    %c4 = arith.constant 4 : index
    %c0_11 = arith.constant 0 : index
    %30 = vector.load %arg2[%c4, %c0_11] : memref<8x256xf32, #tpu.memory_space<vmem>>, vector<1x256xf32>
    %31 = vector.broadcast %30 : vector<1x256xf32> to vector<16x256xf32>
    %32 = arith.mulf %29, %31 : vector<16x256xf32>
    %33 = arith.truncf %32 : vector<16x256xf32> to vector<16x256xbf16>
    %c241_i32 = arith.constant 241 : i32
    %34 = tpu.dynamic_rotate %7 by %c241_i32 dim 1 : vector<16x256xf32>, i32 -> vector<16x256xf32>
    %c5 = arith.constant 5 : index
    %c0_12 = arith.constant 0 : index
    %35 = vector.load %arg2[%c5, %c0_12] : memref<8x256xf32, #tpu.memory_space<vmem>>, vector<1x256xf32>
    %36 = vector.broadcast %35 : vector<1x256xf32> to vector<16x256xf32>
    %37 = arith.mulf %34, %36 : vector<16x256xf32>
    %38 = arith.truncf %37 : vector<16x256xf32> to vector<16x256xbf16>
    %c240_i32 = arith.constant 240 : i32
    %39 = tpu.dynamic_rotate %7 by %c240_i32 dim 1 : vector<16x256xf32>, i32 -> vector<16x256xf32>
    %c6 = arith.constant 6 : index
    %c0_13 = arith.constant 0 : index
    %40 = vector.load %arg2[%c6, %c0_13] : memref<8x256xf32, #tpu.memory_space<vmem>>, vector<1x256xf32>
    %41 = vector.broadcast %40 : vector<1x256xf32> to vector<16x256xf32>
    %42 = arith.mulf %39, %41 : vector<16x256xf32>
    %43 = arith.truncf %42 : vector<16x256xf32> to vector<16x256xbf16>
    %c239_i32 = arith.constant 239 : i32
    %44 = tpu.dynamic_rotate %7 by %c239_i32 dim 1 : vector<16x256xf32>, i32 -> vector<16x256xf32>
    %c7 = arith.constant 7 : index
    %c0_14 = arith.constant 0 : index
    %45 = vector.load %arg2[%c7, %c0_14] : memref<8x256xf32, #tpu.memory_space<vmem>>, vector<1x256xf32>
    %46 = vector.broadcast %45 : vector<1x256xf32> to vector<16x256xf32>
    %47 = arith.mulf %44, %46 : vector<16x256xf32>
    %48 = arith.truncf %47 : vector<16x256xf32> to vector<16x256xbf16>
    %49 = tpu.concatenate %12, %17, %22, %27, %28, %33, %38, %43, %48 in 0 : vector<16x256xbf16>, vector<16x256xbf16>, vector<16x256xbf16>, vector<16x256xbf16>, vector<16x256xbf16>, vector<16x256xbf16>, vector<16x256xbf16>, vector<16x256xbf16>, vector<16x256xbf16> -> vector<144x256xbf16>
    %c0_15 = arith.constant 0 : index
    %c0_16 = arith.constant 0 : index
    %50 = vector.load %arg5[%c0_15, %c0_16] : memref<16x144xbf16, #tpu.memory_space<vmem>>, vector<16x144xbf16>
    %cst_17 = arith.constant dense<0.000000e+00> : vector<16x256xf32>
    %51 = tpu.matmul %50, %49, %cst_17 {dimension_numbers = #tpu.dot_dimension_numbers<[1], [0], [0], [1], [0, 0, 1, 1], [], []>} : vector<16x144xbf16>, vector<144x256xbf16>, vector<16x256xf32> -> vector<16x256xf32>
    %c0_18 = arith.constant 0 : index
    %c0_19 = arith.constant 0 : index
    %52 = vector.load %arg6[%c0_18, %c0_19] : memref<16x1xf32, #tpu.memory_space<vmem>>, vector<16x1xf32>
    %53 = vector.broadcast %52 : vector<16x1xf32> to vector<16x256xf32>
    %54 = arith.addf %51, %53 : vector<16x256xf32>
    %cst_20 = arith.constant 0.000000e+00 : f32
    %55 = vector.broadcast %cst_20 : f32 to vector<16x256xf32>
    %56 = arith.maximumf %54, %55 : vector<16x256xf32>
    %57 = arith.truncf %56 : vector<16x256xf32> to vector<16x256xbf16>
    %58 = tpu.concatenate %57, %0 in 0 : vector<16x256xbf16>, vector<16x256xbf16> -> vector<32x256xbf16>
    %c0_21 = arith.constant 0 : index
    %c0_22 = arith.constant 0 : index
    %59 = vector.load %arg7[%c0_21, %c0_22] : memref<16x32xbf16, #tpu.memory_space<vmem>>, vector<16x32xbf16>
    %cst_23 = arith.constant dense<0.000000e+00> : vector<16x256xf32>
    %60 = tpu.matmul %59, %58, %cst_23 {dimension_numbers = #tpu.dot_dimension_numbers<[1], [0], [0], [1], [0, 0, 1, 1], [], []>} : vector<16x32xbf16>, vector<32x256xbf16>, vector<16x256xf32> -> vector<16x256xf32>
    %c0_24 = arith.constant 0 : index
    %c0_25 = arith.constant 0 : index
    %61 = vector.load %arg8[%c0_24, %c0_25] : memref<16x1xf32, #tpu.memory_space<vmem>>, vector<16x1xf32>
    %62 = vector.broadcast %61 : vector<16x1xf32> to vector<16x256xf32>
    %63 = arith.addf %60, %62 : vector<16x256xf32>
    %cst_26 = arith.constant 0.000000e+00 : f32
    %64 = vector.broadcast %cst_26 : f32 to vector<16x256xf32>
    %65 = arith.maximumf %63, %64 : vector<16x256xf32>
    %c0_27 = arith.constant 0 : index
    %c0_28 = arith.constant 0 : index
    %66 = vector.load %arg9[%c0_27, %c0_28] : memref<16x256xf32, #tpu.memory_space<vmem>>, vector<16x256xf32>
    tpu.vector_store %arg9[%c0_27, %c0_28], %65 {strides = array<i32>} : memref<16x256xf32, #tpu.memory_space<vmem>>, vector<16x256xf32>,
    return
  }
  func.func @transform_0(%arg0: i32) -> (i32, i32) {
    %c0_i32 = arith.constant 0 : i32
    %c0_i32_0 = arith.constant 0 : i32
    return %c0_i32, %arg0 : i32, i32
  }
  func.func @transform_1(%arg0: i32) -> (i32, i32) {
    %c0_i32 = arith.constant 0 : i32
    %c0_i32_0 = arith.constant 0 : i32
    %c0_i32_1 = arith.constant 0 : i32
    return %c0_i32, %c0_i32_0 : i32, i32
  }
  func.func @transform_2(%arg0: i32) -> (i32, i32) {
    %c0_i32 = arith.constant 0 : i32
    %c0_i32_0 = arith.constant 0 : i32
    %c0_i32_1 = arith.constant 0 : i32
    return %c0_i32, %c0_i32_0 : i32, i32
  }
  func.func @transform_3(%arg0: i32) -> (i32, i32) {
    %c0_i32 = arith.constant 0 : i32
    %c0_i32_0 = arith.constant 0 : i32
    %c0_i32_1 = arith.constant 0 : i32
    return %c0_i32, %c0_i32_0 : i32, i32
  }
  func.func @transform_4(%arg0: i32) -> (i32, i32) {
    %c0_i32 = arith.constant 0 : i32
    %c0_i32_0 = arith.constant 0 : i32
    %c0_i32_1 = arith.constant 0 : i32
    return %c0_i32, %c0_i32_0 : i32, i32
  }
  func.func @transform_5(%arg0: i32) -> (i32, i32) {
    %c0_i32 = arith.constant 0 : i32
    %c0_i32_0 = arith.constant 0 : i32
    %c0_i32_1 = arith.constant 0 : i32
    return %c0_i32, %c0_i32_0 : i32, i32
  }
  func.func @transform_6(%arg0: i32) -> (i32, i32) {
    %c0_i32 = arith.constant 0 : i32
    %c0_i32_0 = arith.constant 0 : i32
    %c0_i32_1 = arith.constant 0 : i32
    return %c0_i32, %c0_i32_0 : i32, i32
  }
  func.func @transform_7(%arg0: i32) -> (i32, i32) {
    %c0_i32 = arith.constant 0 : i32
    %c0_i32_0 = arith.constant 0 : i32
    %c0_i32_1 = arith.constant 0 : i32
    return %c0_i32, %c0_i32_0 : i32, i32
  }
  func.func @transform_8(%arg0: i32) -> (i32, i32) {
    %c0_i32 = arith.constant 0 : i32
    %c0_i32_0 = arith.constant 0 : i32
    return %c0_i32, %arg0 : i32, i32
  }
}

</mosaic_0001>

<bundles_post_ra>
// kernel: tpu_custom_call.1
= control target key start
LH: loop header
LB: loop body
LE: loop exit
PB: predicated region body
PF: predicated region fallthrough
CT: control target
= control target key end

     0   :  { %13 = vsyncpa [#allocation4], 0  ;;  %s1603_s0 = inlined_call_operand.vmem [shape: bf16[16,512], index: 0, kind: input, shape index: {}]   ;;  %s1604_s1 = inlined_call_operand.vmem [shape: f32[8,256], index: 1, kind: input, shape index: {}]   ;;  %s1605_s2 = inlined_call_operand.hbm [shape: bf16[16,16], index: 2, kind: input, shape index: {}]   ;;  %s1606_s3 = inlined_call_operand.vmem [shape: f32[16,1], index: 3, kind: input, shape index: {}]   ;;  %s1607_s4 = inlined_call_operand.vmem [shape: bf16[16,144], index: 4, kind: input, shape index: {}]   ;;  %s1608_s5 = inlined_call_operand.vmem [shape: f32[16,1], index: 5, kind: input, shape index: {}]   ;;  %s1609_s6 = inlined_call_operand.vmem [shape: bf16[16,32], index: 6, kind: input, shape index: {}]   ;;  %s1610_s7 = inlined_call_operand.vmem [shape: f32[16,1], index: 7, kind: input, shape index: {}]   ;;  %s1611_s8 = inlined_call_operand.hbm [shape: f32[16,512], index: 8, kind: output, shape index: {}]  }
   0x1   :  { %14 = vsyncpa [#allocation5], 0 }
   0x2   :  { %16 = vsyncpa [#allocation5 + $0x1], 0  ;;  %s1208_s27 = smov 0   ;;  %s1210_s28 = smov 0  }
   0x3   :  { %s1212_s29 = smov 0   ;;  %s1214_s30 = smov 0  }
   0x4 LB: > { %s1229_s9 = sadd.s32 4294967295, %s1146_s30   ;;  %s945_s10 = sadd.s32 4294967294, %s1146_s30   ;;  %s1146_s30 = sphi %s1214_s30, %s1629_s30   ;;  %s1142_s29 = sphi %s1212_s29, %s1628_s29   ;;  %s1138_s28 = sphi %s1210_s28, %s1627_s28   ;;  %s1134_s27 = sphi %s1208_s27, %s1626_s27  }
   0x5   : > { %s1233_s11 = sadd.s32 1, %s1146_s30   ;;  %s29_s12 = sadd.s32 1, %s1142_s29 }
   0x6   : > { %s26_s13 = ssub.s32 %s1146_s30, %s1233_s11  ;;  %p36_p0 = scmp.ne.s32.totalorder %s1142_s29, %s1138_s28 }
   0x7   : > { %p27_p1 = scmp.eq.s32.totalorder %s26_s13, 0  ;;  %p37_p2 = scmp.eq.s32.totalorder %s1146_s30, 0 }
   0x8   : > { %p213_p3 = scmp.eq.s32.totalorder %s1229_s9, 1  ;;  %p218_p4 = scmp.ne.s32.totalorder %s1138_s28, %s1134_s27 }
   0x9   : > { %s1245_s14 = scalar_select %p27_p1, %s1142_s29, %s29_s12  }
   0xa   : > { %p1247_p5 = por %p37_p2, %p36_p0  ;;  %p1251_p6 = por %p213_p3, %p36_p0 }
   0xb   : > { %p219_p7 = scmp.eq.s32.totalorder %s945_s10, 1  ;;  %p946_p8 = scmp.ge.s32.totalorder %s1146_s30, 1 }
   0xc   : > { %s1615_s15 = scalar_select %p1247_p5, 1, 0 }
   0xd   : > { %s1616_s16 = scalar_select %p1251_p6, 1, 0 }
   0xe   : > { %p226_p9 = scmp.lt.s32.totalorder %s1146_s30, 3  ;;  %p1257_p10 = por %p219_p7, %p218_p4 }
   0xf   : > { %p1612_p11 = scmp.eq.s32.totalorder %s1229_s9, 0  ;;  %s1148_s19 = smov [#allocation3]  }
  0x10   : > { %s1617_s17 = scalar_select %p1257_p10, 1, 0 }
  0x11   : > { %p1262_p12 = pnand %p946_p8, %p226_p9  ;;  %s241_s20 = sshll.u32 %s1148_s19, 4  ;;  %s242_s20 = int_to_ptr.vmem [resolvable:$true] %s241_s20 }
  0x12   : > { %s1052_s24 = scalar_lea.hbm %s1605_s2, 128 }
  0x13   : > { %s1618_s18 = scalar_select %p1262_p12, 1, 0 }
  0x14   : > { %p985_p13 = pneg %p1262_p12  ;;  %p1053_p1 = scmp.ne.s32.totalorder %s1605_s2, %s1052_s24 }
  0x15   : > { %p1059_p7 = scmp.lt.u32.totalorder %s1052_s24, %s1605_s2 }
  0x16   : > { %p1270_p0 = pnand %p1612_p11, %p985_p13 }
  0x18   : > { %p1054_p2 = pneg %p1270_p0 }
  0x1a   : > { %p1055_p3 = pnand %p1054_p2, %p1053_p1 }
  0x1c   : > { %p1056_p4 = pneg %p1055_p3 }
  0x1e   : > { %p1061_p8 = pnand %p1059_p7, %p1056_p4 }
  0x20   : > { %1064 = shalt.err (!%p1061_p8)
}
  0x21   : > { %s1065_s13 = scalar_lea.vmem %s242_s20, 128  ;;  %p1073_p10 = scmp.lt.s32.totalorder %s242_s20, %s242_s20 }
  0x22   : > { %p1066_p9 = scmp.ne.s32.totalorder %s242_s20, %s1065_s13  ;;  %p1074_p6 = scmp.lt.s32.totalorder %s1065_s13, %s1065_s13 }
  0x24   : > { %p1068_p13 = pnand %p1066_p9, %p1054_p2  ;;  %p1075_p12 = por %p1074_p6, %p1073_p10 }
  0x26   : > { %p1069_p11 = pneg %p1068_p13 }
  0x28   : > { %p1076_p5 = pnand %p1075_p12, %p1069_p11 }
  0x2a   : > { %1079 = shalt.err (!%p1076_p5)
}
  0x2b   : > { %s1149_s19 = smov 64   ;;  %s1150_s22 = smov 4  }
  0x2c   : > { %988 = dma.hbm_to_vmem [thread:$0]  (!%p1270_p0), %s1605_s2, 128, %s242_s20, [#allocation4], %s1149_s19, %s1149_s19, %s1150_s22  }
  0x2d   : > { %p948_p1 = scmp.ge.s32.totalorder %s1146_s30, 2 }
  0x2e   : > { %p1620_p2 = scmp.ne.s32.totalorder (!%p948_p1), %s1615_s15, 0 }
  0x2f   : > { %266 = sbr.rel (%p948_p1) target bundleno = 61 (0x3d), region = 44 }
  0x36   : > { %269 = sbr.rel (!%p1620_p2) target bundleno = 61 (0x3d), region = 48  ;;  %s271_s24 = sand.u32 (%p1620_p2), 1, %s1142_s29  }
  0x37   : > { %s977_s26 = sshll.u32 (%p1620_p2), %s1146_s30, 3  ;;  %s949_s10 = sshll.u32 (%p1620_p2), %s271_s24, 4 }
  0x38   : > { %s276_s21 = scalar_lea.vmem (%p1620_p2), %s1603_s0, %s977_s26  ;;  %s273_s20 = scalar_lea.vmem (%p1620_p2), [#allocation2], %s949_s10 }
  0x39   : > { %v306_v0 = vld [vmem:[%s276_s21] sm:$0xff] (%p1620_p2)  ;;  %v308_v1 = vld [vmem:[%s276_s21 + $0x10] sm:$0xff] (%p1620_p2) }
  0x3a   : > { %307 = vst [vmem:[%s273_s20] sm:$0xff] (%p1620_p2), %v306_v0  ;;  %309 = vst [vmem:[%s273_s20 + $0x8] sm:$0xff] (%p1620_p2), %v308_v1 }
  0x3d PF: > { %p1621_p5 = scmp.ne.s32.totalorder %s1618_s18, 0 }
  0x3e   : > { %s1303_s15 = sand.u32 (!%p1621_p5), 1, %s1138_s28   ;;  %p1622_p6 = scmp.eq.s32.totalorder (!%p1621_p5), %s1229_s9, 0 }
  0x3f   : > { %318 = sbr.rel (%p1621_p5) target bundleno = 944 (0x3b0), region = 86  ;;  %s953_s19 = sshll.u32 (!%p1621_p5), %s1303_s15, 4 }
  0x40   : > { %s323_s22 = scalar_lea.vmem (!%p1621_p5), [#allocation2], %s953_s19 }
  0x46   : > { %1125 = dma.done.wait (%p1622_p6), [#allocation4], 128   ;;  %p1623_p10 = pmov %p1622_p6 }
  0x47   : > { %v1151_v2 = vmov 0   ;;  %v1310_v3 = vld [vmem:[%s323_s22 + $0x4] ss:$8 sps:$4 sm:$0xff]   ;;  %v1312_v4 = vld [vmem:[%s323_s22] ss:$8 sps:$4 sm:$0xff]   ;;  %vm392_vm0 = vcmask 130048   ;;  %v451_v39 = vlaneseq }
  0x48   : > { %1127 = vsyncadd (%p1623_p10), [#allocation4], 4294967168  ;;  %428 = vmatprep.mubr.bf16.mxu0 %v1151_v2  ;;  %1042 = vset.pattern.permute.xlu0 %v1151_v2  ;;  %v1047_v5 = vld [vmem:[#allocation3] sm:$0xff]   ;;  %v366_v7 = vld [vmem:[%s1606_s3 + $0x8] sm:$0xff]  ;;  %s1152_s26 = smov 16   ;;  %s1153_s10 = smov 17  }
  0x49   : > { %1043 = vset.pattern.permute.xlu1 %v1151_v2  ;;  %396 = vmatprep.subr.bf16.mxu0 %v1310_v3  ;;  %v365_v6 = vld [vmem:[%s1606_s3] sm:$0xff]  ;;  %s1154_s12 = smov 15   ;;  %s1155_s13 = smov 1   ;;  %v705_v27 = vld [vmem:[%s1608_s5 + $0x8] sm:$0xff]  ;;  %v461_v42 = vshrl.u32 %v451_v39, 7  ;;  %v1399_v43 = vand.u32 127, %v451_v39 }
  0x4a   : > { %397 = vmatpush1.bf16.msra.mxu0 %v1312_v4  ;;  %369 = vperm.xlu0 %1042, %v365_v6   ;;  %s1156_s21 = smov 127   ;;  %s1157_s20 = smov 113   ;;  %v704_v24 = vld [vmem:[%s1608_s5] sm:$0xff]  ;;  %v780_v28 = vld [vmem:[%s1610_s7 + $0x8] sm:$0xff]  ;;  %vm796_vm9 = vcmask 261120  }
  0x4b   : > { %s1158_s19 = smov 112   ;;  %s1159_s22 = smov 111   ;;  %v1050_v25 = vld [vmem:[%s1607_s4 + $0x4] ss:$8 sps:$4 sm:$0xff]   ;;  %v1403_v46 = vsub.s32 0, %v461_v42  ;;  %v1405_v47 = vsub.s32 1, %v461_v42 }
  0x4c   : > { %969 = vmatprep.mubr.msk.bf16.mxu1 %vm392_vm0, %v1050_v25  ;;  %v779_v26 = vld [vmem:[%s1610_s7] sm:$0xff]  ;;  %vm453_vm1 = vcmp.lt.s32.totalorder %v1399_v43, 17  ;;  %vm484_vm2 = vcmp.lt.s32.totalorder %v1399_v43, 16  ;;  %vm516_vm3 = vcmp.lt.s32.totalorder %v1399_v43, 15  ;;  %vm548_vm4 = vcmp.lt.s32.totalorder %v1399_v43, 1  ;;  %p1624_p12 = scmp.ne.s32.totalorder %s1616_s16, 0 }
  0x4d   : > { %959 = vmatmul.mubr.msk.bf16.vlgmr.msra.gmra.mrb[0].mxu0 %vm392_vm0, %v1047_v5  ;;  %v458_v48 = vld [vmem:[%s1604_s1] ss:$8 sm:$0x3]  ;;  %v960_v52 = vld [vmem:[%s1604_s1 + $0x1] ss:$8 sm:$0x3] }
  0x4e   : > { %374 = vperm.xlu0 %1042, %v366_v7   ;;  %832 = vmatprep.mubr.bf16.mxu0 %v1151_v2  ;;  %v463_v51 = vrot.slane %v458_v48, %v1403_v46  ;;  %v467_v53 = vrot.slane %v458_v48, %v1405_v47  ;;  %v495_v58 = vrot.slane %v960_v52, %v1403_v46  ;;  %v961_v63 = vld [vmem:[%s1604_s1 + $0x2] ss:$8 sm:$0x3]  ;;  %vm582_vm5 = vcmp.lt.s32.totalorder %v1399_v43, 127 }
  0x4f   : > { %v499_v59 = vrot.slane %v960_v52, %v1405_v47  ;;  %vm614_vm6 = vcmp.lt.s32.totalorder %v1399_v43, 113  ;;  %vm646_vm7 = vcmp.lt.s32.totalorder %v1399_v43, 112  ;;  %vm678_vm8 = vcmp.lt.s32.totalorder %v1399_v43, 111 }
  0xc9   : > { %v370_v8 = vpop.permute.xlu0 %369 }
  0xcd   : > { %v375_v12 = vpop.permute.xlu0 %374 }
 0x120   : > { %v430_v9 = vpop.f32.mrb[0].mxu0 }
 0x121   : > { %v431_v10 = vadd.f32 %v430_v9, %v370_v8  ;;  %v432_v11 = vpop.f32.mrb[1].mxu0 }
 0x122   : > { %v433_v13 = vadd.f32 %v432_v11, %v370_v8  ;;  %v434_v14 = vpop.f32.mrb[2].mxu0  ;;  %v527_v11 = vrot.slane %v961_v63, %v1403_v46 }
 0x123   : > { %v1323_v15 = vmax.f32 %v431_v10, 0.0  ;;  %v435_v16 = vadd.f32 %v434_v14, %v375_v12  ;;  %v436_v17 = vpop.f32.mrb[3].mxu0 }
 0x124   : > { %v437_v18 = vadd.f32 %v436_v17, %v375_v12  ;;  %v1330_v20 = vmax.f32 %v433_v13, 0.0  ;;  %v531_v12 = vrot.slane %v961_v63, %v1405_v47 }
 0x125   : > { %v1325_v19 = vmax.f32 %v435_v16, 0.0  ;;  %476 = vrot.lane.b32.xlu0 %v1323_v15, %s1152_s26  ;;  %443 = vrot.lane.b32.xlu1 %v1323_v15, %s1153_s10 }
 0x126   : > { %v1332_v21 = vmax.f32 %v437_v18, 0.0  ;;  %v962_v18 = vld [vmem:[%s1604_s1 + $0x3] ss:$8 sm:$0x3] }
 0x127   : > { %v572_v22 = vpack.c.bf16 %v1325_v19, %v1323_v15  ;;  %v563_v39 = vrot.slane %v962_v18, %v1405_v47 }
 0x128   : > { %v573_v23 = vpack.c.bf16 %v1332_v21, %v1330_v20 }
 0x129   : > { %508 = vrot.lane.b32.xlu0 %v1323_v15, %s1154_s12  ;;  %445 = vrot.lane.b32.xlu1 %v1325_v19, %s1153_s10 }
 0x12d   : > { %540 = vrot.lane.b32.xlu0 %v1323_v15, %s1155_s13  ;;  %478 = vrot.lane.b32.xlu1 %v1325_v19, %s1152_s26 }
 0x131   : > { %574 = vrot.lane.b32.xlu0 %v1323_v15, %s1156_s21  ;;  %510 = vrot.lane.b32.xlu1 %v1325_v19, %s1154_s12 }
 0x135   : > { %606 = vrot.lane.b32.xlu0 %v1323_v15, %s1157_s20  ;;  %542 = vrot.lane.b32.xlu1 %v1325_v19, %s1155_s13 }
 0x139   : > { %638 = vrot.lane.b32.xlu0 %v1323_v15, %s1158_s19  ;;  %576 = vrot.lane.b32.xlu1 %v1325_v19, %s1156_s21 }
 0x13d   : > { %447 = vrot.lane.b32.xlu0 %v1330_v20, %s1153_s10  ;;  %608 = vrot.lane.b32.xlu1 %v1325_v19, %s1157_s20 }
 0x141   : > { %480 = vrot.lane.b32.xlu0 %v1330_v20, %s1152_s26  ;;  %640 = vrot.lane.b32.xlu1 %v1325_v19, %s1158_s19 }
 0x145   : > { %512 = vrot.lane.b32.xlu0 %v1330_v20, %s1154_s12  ;;  %449 = vrot.lane.b32.xlu1 %v1332_v21, %s1153_s10 }
 0x149   : > { %544 = vrot.lane.b32.xlu0 %v1330_v20, %s1155_s13  ;;  %482 = vrot.lane.b32.xlu1 %v1332_v21, %s1152_s26 }
 0x14d   : > { %670 = vrot.lane.b32.xlu0 %v1323_v15, %s1159_s22  ;;  %514 = vrot.lane.b32.xlu1 %v1332_v21, %s1154_s12  ;;  %s1160_s12 = smov [#allocation6]  }
 0x151   : > { %578 = vrot.lane.b32.xlu0 %v1330_v20, %s1156_s21  ;;  %546 = vrot.lane.b32.xlu1 %v1332_v21, %s1155_s13  ;;  %s1084_s13 = sshll.u32 %s1160_s12, 4  ;;  %s1085_s13 = int_to_ptr.vmem [resolvable:$false] %s1084_s13 }
 0x155   : > { %610 = vrot.lane.b32.xlu0 %v1330_v20, %s1157_s20  ;;  %672 = vrot.lane.b32.xlu1 %v1325_v19, %s1159_s22  ;;  %v966_v19 = vld [vmem:[%s1604_s1 + $0x7] ss:$8 sm:$0x3] }
 0x159   : > { %642 = vrot.lane.b32.xlu0 %v1330_v20, %s1158_s19  ;;  %580 = vrot.lane.b32.xlu1 %v1332_v21, %s1156_s21  ;;  %s1086_s21 = scalar_lea.vmem %s1085_s13, 1024 }
 0x15d   : > { %674 = vrot.lane.b32.xlu0 %v1330_v20, %s1159_s22  ;;  %612 = vrot.lane.b32.xlu1 %v1332_v21, %s1157_s20  ;;  %v965_v20 = vld [vmem:[%s1604_s1 + $0x6] ss:$8 sm:$0x3]  ;;  %s955_s20 = sshll.u32 %s1303_s15, 5 }
 0x15e   : > { %s357_s18 = scalar_lea.vmem [#allocation6], %s955_s20 }
 0x161   : > { %708 = vperm.xlu0 %1042, %v704_v24   ;;  %644 = vrot.lane.b32.xlu1 %v1332_v21, %s1158_s19  ;;  %s865_s19 = sshll.u32 %s357_s18, 4  ;;  %s1553_s19 = int_to_ptr.vmem [resolvable:$true] %s865_s19 }
 0x162   : > { %s1080_s10 = scalar_lea.vmem %s1553_s19, 512  ;;  %p1087_p4 = scmp.lt.s32.totalorder %s1553_s19, %s1085_s13 }
 0x163   : > { %p1081_p11 = scmp.ne.s32.totalorder %s1553_s19, %s1080_s10  ;;  %p1088_p7 = scmp.lt.s32.totalorder %s1086_s21, %s1080_s10 }
 0x165   : > { %783 = vperm.xlu0 %1042, %v779_v26   ;;  %676 = vrot.lane.b32.xlu1 %v1332_v21, %s1159_s22  ;;  %s978_s22 = sshll.u32 %s1229_s9, 8  ;;  %s852_s9 = scalar_lea.sflag [#allocation5], %s1303_s15 }
 0x166   : > { %s1558_s24 = scalar_lea.hbm %s1611_s8, %s978_s22  ;;  %p1082_p0 = pnand %p1081_p11, %p1624_p12 }
 0x167   : > { %p1089_p8 = por %p1088_p7, %p1087_p4 }
 0x168   : > { %p1083_p3 = pneg %p1082_p0 }
 0x169   : > { %713 = vperm.xlu1 %1043, %v705_v27  }
 0x16a   : > { %p1090_p9 = pnand %p1089_p8, %p1083_p3 }
 0x16d   : > { %788 = vperm.xlu1 %1043, %v780_v28  }
 0x197   : > { %v477_v29 = vpop.permute.xlu0 %476  ;;  %v444_v30 = vpop.permute.xlu1 %443 }
 0x19b   : > { %v509_v31 = vpop.permute.xlu0 %508  ;;  %v446_v32 = vpop.permute.xlu1 %445 }
 0x19f   : > { %v1387_v33 = vpop.permute.xlu0 %540  ;;  %v479_v34 = vpop.permute.xlu1 %478 }
 0x1a3   : > { %v1389_v35 = vpop.permute.xlu0 %574  ;;  %v511_v36 = vpop.permute.xlu1 %510 }
 0x1a7   : > { %v1391_v37 = vpop.permute.xlu0 %606  ;;  %v1393_v38 = vpop.permute.xlu1 %542 }
 0x1ab   : > { %v1395_v40 = vpop.permute.xlu0 %638  ;;  %v1397_v41 = vpop.permute.xlu1 %576 }
 0x1af   : > { %v448_v44 = vpop.permute.xlu0 %447  ;;  %v1401_v45 = vpop.permute.xlu1 %608 }
 0x1b0   : > { %v454_v54 = vsel %vm453_vm1, %v444_v30, %v448_v44  ;;  %v456_v55 = vsel %vm453_vm1, %v448_v44, %v444_v30 }
 0x1b1   : > { %v470_v62 = vmul.f32 %v463_v51, %v456_v55  ;;  %v471_v1 = vmul.f32 %v467_v53, %v454_v54 }
 0x1b3   : > { %v481_v49 = vpop.permute.xlu0 %480  ;;  %v1411_v50 = vpop.permute.xlu1 %640 }
 0x1b4   : > { %v485_v5 = vsel %vm484_vm2, %v477_v29, %v481_v49  ;;  %v487_v6 = vsel %vm484_vm2, %v481_v49, %v477_v29 }
 0x1b5   : > { %v502_v16 = vmul.f32 %v495_v58, %v487_v6  ;;  %v503_v17 = vmul.f32 %v499_v59, %v485_v5  ;;  %v964_v6 = vld [vmem:[%s1604_s1 + $0x5] ss:$8 sm:$0x3] }
 0x1b7   : > { %v513_v56 = vpop.permute.xlu0 %512  ;;  %v450_v57 = vpop.permute.xlu1 %449 }
 0x1b8   : > { %v455_v60 = vsel %vm453_vm1, %v446_v32, %v450_v57  ;;  %v457_v61 = vsel %vm453_vm1, %v450_v57, %v446_v32  ;;  %v517_v26 = vsel %vm516_vm3, %v509_v31, %v513_v56  ;;  %v519_v27 = vsel %vm516_vm3, %v513_v56, %v509_v31 }
 0x1b9   : > { %v472_v0 = vmul.f32 %v463_v51, %v457_v61  ;;  %v473_v2 = vmul.f32 %v467_v53, %v455_v60  ;;  %v534_v48 = vmul.f32 %v527_v11, %v519_v27  ;;  %v535_v31 = vmul.f32 %v531_v12, %v517_v26 }
 0x1ba   : > { %v657_v26 = vrot.slane %v965_v20, %v1403_v46  ;;  %v661_v27 = vrot.slane %v965_v20, %v1405_v47  ;;  %v1051_v20 = vld [vmem:[%s1609_s6] sm:$0xff]  }
 0x1bb   : > { %v545_v7 = vpop.permute.xlu0 %544  ;;  %v483_v8 = vpop.permute.xlu1 %482  ;;  %v475_v9 = vpack.c.bf16 %v473_v2, %v471_v1  ;;  %v474_v10 = vpack.c.bf16 %v472_v0, %v470_v62 }
 0x1bc   : > { %v486_v13 = vsel %vm484_vm2, %v479_v34, %v483_v8  ;;  %v488_v14 = vsel %vm484_vm2, %v483_v8, %v479_v34  ;;  %v559_v34 = vrot.slane %v962_v18, %v1403_v46  ;;  %v549_v52 = vsel %vm548_vm4, %v1387_v33, %v545_v7 }
 0x1bd   : > { %v504_v24 = vmul.f32 %v495_v58, %v488_v14  ;;  %v505_v25 = vmul.f32 %v499_v59, %v486_v13  ;;  %728 = vmatprep.subr.bf16.mxu1 %v475_v9  ;;  %v551_v53 = vsel %vm548_vm4, %v545_v7, %v1387_v33  ;;  %v567_v60 = vmul.f32 %v563_v39, %v549_v52  ;;  %v963_v33 = vld [vmem:[%s1604_s1 + $0x4] ss:$8 sm:$0x3] }
 0x1be   : > { %729 = vmatpush1.bf16.msra.mxu1 %v474_v10  ;;  %v566_v59 = vmul.f32 %v559_v34, %v551_v53  ;;  %v593_v5 = vrot.slane %v963_v33, %v1403_v46  ;;  %v625_v10 = vrot.slane %v964_v6, %v1403_v46 }
 0x1bf   : > { %v1443_v28 = vpop.permute.xlu0 %670  ;;  %v515_v29 = vpop.permute.xlu1 %514  ;;  %v507_v30 = vpack.c.bf16 %v505_v25, %v503_v17  ;;  %v506_v32 = vpack.c.bf16 %v504_v24, %v502_v16 }
 0x1c0   : > { %v518_v42 = vsel %vm516_vm3, %v511_v36, %v515_v29  ;;  %v520_v44 = vsel %vm516_vm3, %v515_v29, %v511_v36 }
 0x1c1   : > { %v536_v49 = vmul.f32 %v527_v11, %v520_v44  ;;  %v537_v51 = vmul.f32 %v531_v12, %v518_v42  ;;  %730 = vmatprep.subr.bf16.mxu1 %v507_v30  ;;  %v629_v11 = vrot.slane %v964_v6, %v1405_v47 }
 0x1c2   : > { %731 = vmatpush1.bf16.msra.mxu1 %v506_v32 }
 0x1c3   : > { %v579_v54 = vpop.permute.xlu0 %578  ;;  %v547_v55 = vpop.permute.xlu1 %546  ;;  %v539_v56 = vpack.c.bf16 %v537_v51, %v535_v31  ;;  %v538_v57 = vpack.c.bf16 %v536_v49, %v534_v48  ;;  %v689_v31 = vrot.slane %v966_v19, %v1403_v46  ;;  %v693_v49 = vrot.slane %v966_v19, %v1405_v47 }
 0x1c4   : > { %v550_v36 = vsel %vm548_vm4, %v1393_v38, %v547_v55  ;;  %v552_v58 = vsel %vm548_vm4, %v547_v55, %v1393_v38  ;;  %v597_v38 = vrot.slane %v963_v33, %v1405_v47  ;;  %v583_v7 = vsel %vm582_vm5, %v1389_v35, %v579_v54 }
 0x1c5   : > { %v568_v61 = vmul.f32 %v559_v34, %v552_v58  ;;  %v569_v62 = vmul.f32 %v563_v39, %v550_v36  ;;  %732 = vmatprep.subr.bf16.mxu1 %v539_v56  ;;  %v585_v8 = vsel %vm582_vm5, %v579_v54, %v1389_v35  ;;  %v600_v13 = vmul.f32 %v593_v5, %v583_v7 }
 0x1c6   : > { %733 = vmatpush1.bf16.msra.mxu1 %v538_v57  ;;  %v601_v14 = vmul.f32 %v597_v38, %v585_v8 }
 0x1c7   : > { %v611_v63 = vpop.permute.xlu0 %610  ;;  %v1467_v0 = vpop.permute.xlu1 %672  ;;  %v571_v1 = vpack.c.bf16 %v569_v62, %v567_v60  ;;  %v570_v2 = vpack.c.bf16 %v568_v61, %v566_v59 }
 0x1c8   : > { %v615_v17 = vsel %vm614_vm6, %v1391_v37, %v611_v63  ;;  %v617_v18 = vsel %vm614_vm6, %v611_v63, %v1391_v37  ;;  %v1048_v63 = vld [vmem:[%s1607_s4] ss:$8 sps:$4 sm:$0xff]  }
 0x1c9   : > { %734 = vmatprep.subr.bf16.mxu1 %v571_v1  ;;  %v632_v30 = vmul.f32 %v625_v10, %v615_v17  ;;  %v633_v15 = vmul.f32 %v629_v11, %v617_v18 }
 0x1ca   : > { %735 = vmatpush1.bf16.msra.mxu1 %v570_v2 }
 0x1cb   : > { %736 = vmatprep.subr.bf16.mxu1 %v573_v23  ;;  %v581_v9 = vpop.permute.xlu1 %580  ;;  %v643_v21 = vpop.permute.xlu0 %642 }
 0x1cc   : > { %v584_v12 = vsel %vm582_vm5, %v1397_v41, %v581_v9  ;;  %v586_v35 = vsel %vm582_vm5, %v581_v9, %v1397_v41  ;;  %v647_v34 = vsel %vm646_vm7, %v1395_v40, %v643_v21  ;;  %v649_v39 = vsel %vm646_vm7, %v643_v21, %v1395_v40 }
 0x1cd   : > { %v602_v23 = vmul.f32 %v593_v5, %v584_v12  ;;  %v603_v16 = vmul.f32 %v597_v38, %v586_v35  ;;  %v664_v40 = vmul.f32 %v657_v26, %v647_v34  ;;  %v665_v53 = vmul.f32 %v661_v27, %v649_v39 }
 0x1ce   : > { %737 = vmatpush1.bf16.msra.mxu1 %v572_v22 }
 0x1cf   : > { %v613_v41 = vpop.permute.xlu1 %612  ;;  %v605_v24 = vpack.c.bf16 %v603_v16, %v601_v14  ;;  %v604_v25 = vpack.c.bf16 %v602_v23, %v600_v13 }
 0x1d0   : > { %v616_v29 = vsel %vm614_vm6, %v1401_v45, %v613_v41  ;;  %v618_v37 = vsel %vm614_vm6, %v613_v41, %v1401_v45  ;;  %v675_v45 = vpop.permute.xlu0 %674 }
 0x1d1   : > { %v634_v22 = vmul.f32 %v625_v10, %v616_v29  ;;  %v635_v32 = vmul.f32 %v629_v11, %v618_v37  ;;  %738 = vmatprep.subr.bf16.mxu1 %v605_v24  ;;  %v679_v56 = vsel %vm678_vm8, %v1443_v28, %v675_v45  ;;  %v681_v46 = vsel %vm678_vm8, %v675_v45, %v1443_v28 }
 0x1d2   : > { %739 = vmatpush1.bf16.msra.mxu1 %v604_v25  ;;  %v696_v59 = vmul.f32 %v689_v31, %v679_v56  ;;  %v697_v60 = vmul.f32 %v693_v49, %v681_v46 }
 0x1d3   : > { %v645_v42 = vpop.permute.xlu1 %644  ;;  %v637_v44 = vpack.c.bf16 %v635_v32, %v633_v15  ;;  %v636_v48 = vpack.c.bf16 %v634_v22, %v632_v30 }
 0x1d4   : > { %v648_v51 = vsel %vm646_vm7, %v1411_v50, %v645_v42  ;;  %v650_v52 = vsel %vm646_vm7, %v645_v42, %v1411_v50 }
 0x1d5   : > { %v666_v54 = vmul.f32 %v657_v26, %v648_v51  ;;  %v667_v55 = vmul.f32 %v661_v27, %v650_v52  ;;  %740 = vmatprep.subr.bf16.mxu1 %v637_v44 }
 0x1d6   : > { %741 = vmatpush1.bf16.msra.mxu1 %v636_v48 }
 0x1d7   : > { %v677_v47 = vpop.permute.xlu1 %676  ;;  %v669_v57 = vpack.c.bf16 %v667_v55, %v665_v53  ;;  %v668_v36 = vpack.c.bf16 %v666_v54, %v664_v40 }
 0x1d8   : > { %v680_v50 = vsel %vm678_vm8, %v1467_v0, %v677_v47  ;;  %v682_v58 = vsel %vm678_vm8, %v677_v47, %v1467_v0 }
 0x1d9   : > { %v698_v61 = vmul.f32 %v689_v31, %v680_v50  ;;  %v699_v62 = vmul.f32 %v693_v49, %v682_v58  ;;  %742 = vmatprep.subr.bf16.mxu1 %v669_v57 }
 0x1da   : > { %743 = vmatpush1.bf16.msra.mxu1 %v668_v36 }
 0x1db   : > { %v701_v33 = vpack.c.bf16 %v699_v62, %v697_v60  ;;  %v700_v28 = vpack.c.bf16 %v698_v61, %v696_v59 }
 0x1dd   : > { %744 = vmatprep.subr.bf16.mxu1 %v701_v33 }
 0x1de   : > { %745 = vmatpush1.bf16.msra.mxu1 %v700_v28 }
 0x1e0   : > { %v709_v1 = vpop.permute.xlu0 %708 }
 0x1e1   : > { %761 = vmatmul.mubr.bf16.vlgmr.msra.gmra.mrb[0].mxu1 %v1048_v63 }
 0x1e4   : > { %v784_v21 = vpop.permute.xlu0 %783 }
 0x1e8   : > { %v714_v0 = vpop.permute.xlu1 %713 }
 0x1ec   : > { %v789_v18 = vpop.permute.xlu1 %788 }
 0x2b4   : > { %v762_v2 = vpop.f32.mrb[0].mxu1 }
 0x2b5   : > { %v763_v5 = vadd.f32 %v762_v2, %v709_v1  ;;  %v764_v43 = vpop.f32.mrb[1].mxu1 }
 0x2b6   : > { %v765_v38 = vadd.f32 %v764_v43, %v709_v1  ;;  %v766_v6 = vpop.f32.mrb[2].mxu1 }
 0x2b7   : > { %v767_v7 = vadd.f32 %v766_v6, %v714_v0  ;;  %v768_v8 = vpop.f32.mrb[3].mxu1  ;;  %v771_v10 = vmax.f32 %v763_v5, 0.0 }
 0x2b8   : > { %v769_v9 = vadd.f32 %v768_v8, %v714_v0  ;;  %v772_v12 = vmax.f32 %v765_v38, 0.0 }
 0x2b9   : > { %v773_v11 = vmax.f32 %v767_v7, 0.0 }
 0x2ba   : > { %v774_v35 = vmax.f32 %v769_v9, 0.0 }
 0x2bb   : > { %v775_v13 = vpack.c.bf16 %v773_v11, %v771_v10 }
 0x2bc   : > { %v776_v14 = vpack.c.bf16 %v774_v35, %v772_v12 }
 0x2be   : > { %800 = vmatprep.subr.bf16.mxu0 %v776_v14 }
 0x2bf   : > { %801 = vmatpush1.bf16.msra.mxu0 %v775_v13 }
 0x2c0   : > { %802 = vmatprep.subr.bf16.mxu0 %v1310_v3 }
 0x2c3   : > { %803 = vmatpush1.bf16.msra.mxu0 %v1312_v4 }
 0x2c6   : > { %971 = vmatmul.mubr.msk.bf16.vlgmr.msra.gmra.mrb[4].mxu0 %vm796_vm9, %v1051_v20 }
 0x399   : > { %v834_v23 = vpop.f32.mrb[4].mxu0 }
 0x39a   : > { %v835_v16 = vadd.f32 %v834_v23, %v784_v21  ;;  %v836_v17 = vpop.f32.mrb[5].mxu0 }
 0x39b   : > { %v837_v41 = vadd.f32 %v836_v17, %v784_v21  ;;  %v838_v24 = vpop.f32.mrb[6].mxu0 }
 0x39c   : > { %v843_v3 = vmax.f32 %v835_v16, 0.0  ;;  %v839_v25 = vadd.f32 %v838_v24, %v789_v18  ;;  %v840_v26 = vpop.f32.mrb[7].mxu0 }
 0x39d   : > { %v844_v4 = vmax.f32 %v837_v41, 0.0  ;;  %v841_v27 = vadd.f32 %v840_v26, %v789_v18 }
 0x39e   : > { %847 = vst [vmem:[%s357_s18] sm:$0xff] %v843_v3  ;;  %v845_v29 = vmax.f32 %v839_v25, 0.0 }
 0x39f   : > { %848 = vst [vmem:[%s357_s18 + $0x8] sm:$0xff] %v844_v4  ;;  %v846_v37 = vmax.f32 %v841_v27, 0.0 }
 0x3a0   : > { %849 = vst [vmem:[%s357_s18 + $0x10] sm:$0xff] %v845_v29 }
 0x3a1   : > { %850 = vst [vmem:[%s357_s18 + $0x18] sm:$0xff] %v846_v37 }
 0x3a2   : > { %1093 = shalt.err (!%p1090_p9)
}
 0x3a3   : > { %s1094_s20 = scalar_lea.hbm %s1558_s24, 512  ;;  %s1098_s23 = scalar_lea.hbm %s1611_s8, 1024 }
 0x3a4   : > { %p1095_p13 = scmp.ne.s32.totalorder %s1558_s24, %s1094_s20  ;;  %p1099_p6 = scmp.lt.u32.totalorder %s1558_s24, %s1611_s8 }
 0x3a5   : > { %p1100_p10 = scmp.lt.u32.totalorder %s1098_s23, %s1094_s20  ;;  %p1102_p0 = scmp.lt.u32.totalorder %s1094_s20, %s1558_s24 }
 0x3a6   : > { %p1096_p2 = pnand %p1095_p13, %p1624_p12 }
 0x3a7   : > { %p1101_p11 = por %p1100_p10, %p1099_p6 }
 0x3a8   : > { %p1097_p5 = pneg %p1096_p2 }
 0x3a9   : > { %p1103_p3 = por %p1102_p0, %p1101_p11 }
 0x3ab   : > { %p1104_p4 = pnand %p1103_p3, %p1097_p5 }
 0x3ad   : > { %1107 = shalt.err (!%p1104_p4)
}
 0x3ae   : > { %s1161_s10 = smov 256   ;;  %s1162_s13 = smov 512  }
 0x3af   : > { %983 = dma.vmem_to_hbm [thread:$0]  (%p1624_p12), %s1553_s19, 512, %s1558_s24, %s852_s9, %s1161_s10, %s1162_s13, %s1152_s26  }
 0x3b0 PF: > { %s880_s21 = sand.u32 1, %s1134_s27   ;;  %p1625_p7 = scmp.ne.s32.totalorder %s1617_s17, 0 }
 0x3b1   : > { %s881_s20 = scalar_lea.sflag [#allocation5], %s880_s21 }
 0x3b2   : > { %p990_p8 = pnand %p948_p1, %p1625_p7 }
 0x3b4   : > { %1129 = dma.done.wait (!%p990_p8), %s881_s20, 512  }
 0x3b5   : > { %1131 = vsyncadd (!%p990_p8), %s881_s20, 4294966784  ;;  %p19_p9 = scmp.ge.s32.totalorder %s1233_s11, 4   ;;  %s1626_s27 = smov %s1138_s28 }
 0x3b6   : > { %s1627_s28 = smov %s1142_s29  ;;  %s1628_s29 = smov %s1245_s14 }
 0x3b7   : > { %s1629_s30 = smov %s1233_s11  ;;  %21 = sbr.rel (!%p19_p9) target bundleno = 4 (0x4), region = 142 }
 0x3be   :  { %886 = vsyncpa [#allocation4], 1 }
 0x3bf   :  { %888 = vsyncpa [#allocation4 + $0x1], 1 }
 0x3c0   :  { %889 = vsyncpa [#allocation5], 1 }
 0x3c1   :  { %891 = vsyncpa [#allocation5 + $0x1], 1 }

</bundles_post_ra>
